<compile_context>
chip_gen: v6e
topology: v6e:2x2x1
jax: 0.10.0
libtpu: 0.0.40
codegen_flags: <defaults>
</compile_context>

<pallas_src>
import jax
import jax.numpy as jnp
from jax.experimental import pallas as pl
from jax.experimental.pallas import tpu as pltpu


def _round_up(n, m):
    return ((n + m - 1) // m) * m


def _cdiv(a, b):
    return (a + b - 1) // b


def _vmem_budget_bytes():
    """Per-TensorCore VMEM limit: physical capacity minus ~12.5% headroom for
    compiler-internal scratch / DMA descriptors (≈56 MiB v7x, ≈112 MiB v5e/v6e)."""
    cap = 128 * 1024 * 1024
    try:
        info_cap = int(pltpu.get_tpu_info().vmem_capacity_bytes)
        if info_cap >= 16 * 1024 * 1024:
            cap = info_cap
    except Exception:
        pass
    return cap - cap // 8


def _choose_k_tile(F_pad, H_pad, tile, cd_bytes, rep_bytes, vmem_limit):
    """Pick fc1's contraction-tile so everything fits the VMEM budget.
    Returns (k_tile, F_kpad).  k_tile == F_pad means w1 is fully resident."""
    # VMEM that is resident regardless of how fc1's F dim is tiled.
    resident = (3 * H_pad * H_pad + H_pad) * cd_bytes   # w2..w4 + w5 row (1 buf)
    resident += 4 * H_pad * 4                            # b1..b4 (f32, 1 buf)
    resident += tile * H_pad * 4                          # fc1 f32 accumulator
    resident += 2 * tile * H_pad * rep_bytes              # rep tile (double-buf)
    resident += 2 * tile * 4                               # out tile (double-buf)
    budget = vmem_limit - resident - (4 << 20)             # extra compiler margin
    # Never go below a single 128-wide chunk (TODO(synk): shrink batch tile if
    # even that does not fit for extreme H_pad).
    budget = max(budget, 2 * 128 * (H_pad + tile) * cd_bytes)

    # Whole-weight residency: w1 single-buffered + x tile double-buffered.
    if (F_pad * H_pad + 2 * tile * F_pad) * cd_bytes <= budget:
        return F_pad, F_pad

    # Stream fc1 over K chunks: w1 chunk + x chunk, both double-buffered.
    per_k_col = 2 * (H_pad + tile) * cd_bytes
    kt_max = max(128, (budget // per_k_col) // 128 * 128)
    nk = _cdiv(F_pad, kt_max)
    kt = _round_up(_cdiv(F_pad, nk), 128)   # extra F padding bounded by <128*nk
    return kt, kt * nk


def _mlp_kernel(x_ref,
                w1_ref, b1_ref,
                w2_ref, b2_ref,
                w3_ref, b3_ref,
                w4_ref, b4_ref,
                w5_ref, b5_ref,
                out_ref, rep_ref,
                acc_ref):
    """Fused 5-layer MLP.  Grid = (batch_tiles, fc1_k_tiles).  The trailing k
    axis streams fc1's contraction dim (1 step when w1 is fully resident);
    fc2..fc5 run on the last k step only (accumulator init/finalize pattern)."""
    k = pl.program_id(1)
    nk = pl.num_programs(1)
    cd = w1_ref.dtype

    @pl.when(k == 0)
    def _():
        acc_ref[...] = jnp.zeros_like(acc_ref)

    # fc1 partial product for this K chunk (MXU, f32 accumulation).
    acc_ref[...] += jnp.dot(x_ref[...], w1_ref[...],
                            preferred_element_type=jnp.float32)

    @pl.when(k == nk - 1)
    def _():
        def dense_relu(h, w_ref, b_ref):
            z = jnp.dot(h.astype(cd), w_ref[...],
                        preferred_element_type=jnp.float32)
            return jnp.maximum(z + b_ref[...], 0.0)

        h = jnp.maximum(acc_ref[...] + b1_ref[...], 0.0)   # fc1+relu1 (+drop1=id)
        h = dense_relu(h, w2_ref, b2_ref)                  # fc2+relu2 (+drop2=id)
        h = dense_relu(h, w3_ref, b3_ref)                  # fc3+relu3 (+drop3=id)
        h = dense_relu(h, w4_ref, b4_ref)                  # fc4+relu4
        rep_ref[...] = h.astype(rep_ref.dtype)             # representation

        # drop4 = id, then fc5 (hidden -> 1) as a VPU multiply + lane reduction
        # fused on the fc4 epilogue (h still in vregs); padded w5 cols are 0.
        w5_row = w5_ref[...].astype(jnp.float32)
        o = jnp.sum(h * w5_row, axis=-1, keepdims=True)     # (tile, 1) f32
        out_ref[...] = (o + b5_ref[0, 0]).astype(out_ref.dtype)


def prepare_params(params, compute_dtype=jnp.float32):
    """Pad weights once to lane-dense (multiples of 128) shapes and convert to
    the MXU compute dtype.  Biases stay f32 (added to f32 accumulators).
    params: w1..w5 stored as [in, out], b1..b5 as [1, out] (w5 is [hidden, 1])."""
    F, H = params["w1"].shape
    F_pad = _round_up(F, 128)
    H_pad = _round_up(H, 128)

    def pad2(a, rows, cols):
        return jnp.pad(a, ((0, rows - a.shape[0]), (0, cols - a.shape[1])))

    return {
        "w1": pad2(params["w1"], F_pad, H_pad).astype(compute_dtype),
        "b1": pad2(params["b1"], 1, H_pad).astype(jnp.float32),
        "w2": pad2(params["w2"], H_pad, H_pad).astype(compute_dtype),
        "b2": pad2(params["b2"], 1, H_pad).astype(jnp.float32),
        "w3": pad2(params["w3"], H_pad, H_pad).astype(compute_dtype),
        "b3": pad2(params["b3"], 1, H_pad).astype(jnp.float32),
        "w4": pad2(params["w4"], H_pad, H_pad).astype(compute_dtype),
        "b4": pad2(params["b4"], 1, H_pad).astype(jnp.float32),
        "w5": pad2(params["w5"].T, 1, H_pad).astype(compute_dtype),  # (1, H_pad) row
        "b5": params["b5"].astype(jnp.float32).reshape(1, 1),
        "num_features": F,
        "hidden_dim": H,
        "compute_dtype": compute_dtype,
    }


def fc_avg_net_over_geno_forward(x, prepped, *, batch_tile=None, k_tile=None):
    """Fused MLP forward pass as a single Pallas kernel.

    x: [B, num_features] float32 (cast to the compute dtype).
    Returns (out [B, 1] f32, representation [B, hidden_dim] in compute dtype).
    """
    B, F = x.shape
    H = prepped["hidden_dim"]
    assert F == prepped["num_features"], "feature dim mismatch with params"
    F_pad, H_pad = prepped["w1"].shape
    cd = prepped["compute_dtype"]
    cd_bytes = jnp.dtype(cd).itemsize
    rep_dtype = cd                      # bf16 rep halves the dominant HBM write
    rep_bytes = jnp.dtype(rep_dtype).itemsize

    vmem_limit = _vmem_budget_bytes()

    # ---- batch (M) tiling --------------------------------------------------
    if batch_tile is None:
        batch_tile = 512 if vmem_limit >= (96 << 20) else 256   # v5e/v6e vs v7x
    batch_tile = max(8, _round_up(batch_tile, 8))
    B8 = _round_up(max(B, 8), 8)
    nb = max(1, _cdiv(B8, batch_tile))
    if nb == 1 and B8 >= 16:
        nb = 2          # keep >=2 batch tiles so v7x's 2 TensorCores both work
    tile = _round_up(_cdiv(B8, nb), 8)   # dead-row padding bounded by <8/step
    B_pad = tile * nb

    # ---- fc1 contraction (F) tiling: resident w1 if it fits, else stream ---
    if k_tile is None:
        k_tile, F_kpad = _choose_k_tile(F_pad, H_pad, tile, cd_bytes,
                                        rep_bytes, vmem_limit)
    else:
        k_tile = max(128, _round_up(k_tile, 128))
        F_kpad = _round_up(F_pad, k_tile)
    nk = F_kpad // k_tile

    xp = jnp.pad(x, ((0, B_pad - B), (0, F_kpad - F))).astype(cd)
    w1 = prepped["w1"]
    if F_kpad > F_pad:
        w1 = jnp.pad(w1, ((0, F_kpad - F_pad), (0, 0)))

    weight_args = (w1, prepped["b1"], prepped["w2"], prepped["b2"],
                   prepped["w3"], prepped["b3"], prepped["w4"], prepped["b4"],
                   prepped["w5"], prepped["b5"])

    row_map = lambda i, k: (i, 0)
    const_map = lambda i, k: (0, 0)
    resident = pl.Buffered(1)     # constant blocks: no dead second VMEM copy

    if nk == 1:
        w1_spec = pl.BlockSpec((F_kpad, H_pad), const_map, pipeline_mode=resident)
    else:
        # Streamed over K: keep default double-buffering to hide the DMA.
        w1_spec = pl.BlockSpec((k_tile, H_pad), lambda i, k: (k, 0))

    in_specs = [
        pl.BlockSpec((tile, k_tile), lambda i, k: (i, k)),                 # x
        w1_spec,                                                           # w1
        pl.BlockSpec((1, H_pad), const_map, pipeline_mode=resident),       # b1
        pl.BlockSpec((H_pad, H_pad), const_map, pipeline_mode=resident),   # w2
        pl.BlockSpec((1, H_pad), const_map, pipeline_mode=resident),       # b2
        pl.BlockSpec((H_pad, H_pad), const_map, pipeline_mode=resident),   # w3
        pl.BlockSpec((1, H_pad), const_map, pipeline_mode=resident),       # b3
        pl.BlockSpec((H_pad, H_pad), const_map, pipeline_mode=resident),   # w4
        pl.BlockSpec((1, H_pad), const_map, pipeline_mode=resident),       # b4
        pl.BlockSpec((1, H_pad), const_map, pipeline_mode=resident),       # w5 row
        pl.BlockSpec(memory_space=pltpu.MemorySpace.SMEM),                 # b5 scalar
    ]
    out_specs = (
        pl.BlockSpec((tile, 1), row_map),        # out (tiny; masked store is fine)
        pl.BlockSpec((tile, H_pad), row_map),    # representation (compute dtype)
    )
    out_shape = (
        jax.ShapeDtypeStruct((B_pad, 1), jnp.float32),
        jax.ShapeDtypeStruct((B_pad, H_pad), rep_dtype),
    )

    flops = 2 * B_pad * (F_kpad * H_pad + 3 * H_pad * H_pad + H_pad)
    bytes_accessed = (xp.size * xp.dtype.itemsize
                      + sum(a.size * a.dtype.itemsize for a in weight_args)
                      + B_pad * 4
                      + B_pad * H_pad * rep_bytes)
    cost = pl.CostEstimate(flops=flops, transcendentals=0,
                           bytes_accessed=bytes_accessed)

    out, rep = pl.pallas_call(
        _mlp_kernel,
        grid=(nb, nk),
        in_specs=in_specs,
        out_specs=out_specs,
        out_shape=out_shape,
        scratch_shapes=[pltpu.VMEM((tile, H_pad), jnp.float32)],   # fc1 accumulator
        cost_estimate=cost,
        compiler_params=pltpu.CompilerParams(
            dimension_semantics=("parallel", "arbitrary"),
            vmem_limit_bytes=vmem_limit),
    )(xp, *weight_args)

    # Slice off padding only when it actually exists (avoids an extra HBM pass
    # over the largest output when shapes are already aligned).
    if B_pad != B:
        out = out[:B]
    if B_pad != B and H_pad != H:
        rep = rep[:B, :H]
    elif B_pad != B:
        rep = rep[:B]
    elif H_pad != H:
        rep = rep[:, :H]
    return out, rep


def init_params(key, num_features, hidden_dim):
    """PyTorch-style Linear init: U(-1/sqrt(fan_in), 1/sqrt(fan_in)).
    Weights stored as [in, out] (transpose of PyTorch's [out, in])."""
    dims = [(num_features, hidden_dim),
            (hidden_dim, hidden_dim),
            (hidden_dim, hidden_dim),
            (hidden_dim, hidden_dim),
            (hidden_dim, 1)]
    params = {}
    for idx, (fin, fout) in enumerate(dims, start=1):
        key, kw, kb = jax.random.split(key, 3)
        bound = 1.0 / jnp.sqrt(jnp.float32(fin))
        params[f"w{idx}"] = jax.random.uniform(
            kw, (fin, fout), jnp.float32, minval=-bound, maxval=bound)
        params[f"b{idx}"] = jax.random.uniform(
            kb, (1, fout), jnp.float32, minval=-bound, maxval=bound)
    return params


def reference_forward(x, params, compute_dtype=jnp.float32):
    """Pure-JAX reference (eval-mode dropout = identity) mirroring the kernel's
    numerics (compute_dtype matmuls with f32 accumulation, fc5 as a reduce)."""
    c = compute_dtype

    def dense_relu(h, w, b):
        z = jnp.dot(h.astype(c), w.astype(c),
                    preferred_element_type=jnp.float32)
        return jnp.maximum(z + b, 0.0)

    h = dense_relu(x, params["w1"], params["b1"])
    h = dense_relu(h, params["w2"], params["b2"])
    h = dense_relu(h, params["w3"], params["b3"])
    h = dense_relu(h, params["w4"], params["b4"])
    rep = h
    w5_row = params["w5"].reshape(1, -1).astype(c).astype(jnp.float32)
    out = jnp.sum(h * w5_row, axis=-1, keepdims=True) + params["b5"]
    return out, rep


if __name__ == "__main__":
    key = jax.random.PRNGKey(0)
    batch, num_features, hidden_dim = 16, 24, 32

    kx, kp = jax.random.split(key)
    x = jax.random.normal(kx, (batch, num_features), jnp.float32)
    params = init_params(kp, num_features, hidden_dim)

    # --- f32 compute path (w1 fully resident, nk == 1): exact check. --------
    pf32 = prepare_params(params, compute_dtype=jnp.float32)
    out, rep = fc_avg_net_over_geno_forward(x, pf32)
    jax.block_until_ready((out, rep))
    ref_out, ref_rep = reference_forward(x, params, jnp.float32)
    assert out.shape == (batch, 1) and rep.shape == (batch, hidden_dim)
    assert jnp.allclose(out, ref_out, atol=1e-5, rtol=1e-5)
    assert jnp.allclose(rep.astype(jnp.float32), ref_rep, atol=1e-5, rtol=1e-5)

    # --- bf16 weights/activations (fast MXU path), f32 accumulation. --------
    pbf16 = prepare_params(params, compute_dtype=jnp.bfloat16)
    out_bf, rep_bf = fc_avg_net_over_geno_forward(x, pbf16)
    jax.block_until_ready((out_bf, rep_bf))
    ref_out_bf, ref_rep_bf = reference_forward(x, params, jnp.bfloat16)
    assert out_bf.shape == (batch, 1) and rep_bf.shape == (batch, hidden_dim)
    assert jnp.allclose(out_bf, ref_out_bf, atol=2e-2, rtol=2e-2)
    assert jnp.allclose(rep_bf.astype(jnp.float32), ref_rep_bf,
                        atol=2e-2, rtol=2e-2)

    # --- K-tiled fc1 fallback path (forced): exercises the accumulator. -----
    num_features_big = 300                       # F_pad = 384 -> 3 K-chunks of 128
    kx2, kp2 = jax.random.split(kp)
    x_big = jax.random.normal(kx2, (batch, num_features_big), jnp.float32)
    params_big = init_params(kp2, num_features_big, hidden_dim)
    p_big = prepare_params(params_big, compute_dtype=jnp.float32)
    out_k, rep_k = fc_avg_net_over_geno_forward(x_big, p_big, k_tile=128)
    jax.block_until_ready((out_k, rep_k))
    ref_out_k, ref_rep_k = reference_forward(x_big, params_big, jnp.float32)
    assert out_k.shape == (batch, 1) and rep_k.shape == (batch, hidden_dim)
    assert jnp.allclose(out_k, ref_out_k, atol=1e-4, rtol=1e-4)
    assert jnp.allclose(rep_k.astype(jnp.float32), ref_rep_k,
                        atol=1e-4, rtol=1e-4)

    print("KERNEL_OK")
</pallas_src>

<mosaic_0001>
module attributes {stable_mosaic.version = 11 : i64} {
  func.func @_mlp_kernel(%arg0: i32, %arg1: i32, %arg2: memref<8x128xf32, #tpu.memory_space<vmem>>, %arg3: memref<128x128xf32, #tpu.memory_space<vmem>>, %arg4: memref<1x128xf32, #tpu.memory_space<vmem>>, %arg5: memref<128x128xf32, #tpu.memory_space<vmem>>, %arg6: memref<1x128xf32, #tpu.memory_space<vmem>>, %arg7: memref<128x128xf32, #tpu.memory_space<vmem>>, %arg8: memref<1x128xf32, #tpu.memory_space<vmem>>, %arg9: memref<128x128xf32, #tpu.memory_space<vmem>>, %arg10: memref<1x128xf32, #tpu.memory_space<vmem>>, %arg11: memref<1x128xf32, #tpu.memory_space<vmem>>, %arg12: memref<1x1xf32, #tpu.memory_space<smem>>, %arg13: memref<8x1xf32, #tpu.memory_space<vmem>>, %arg14: memref<8x128xf32, #tpu.memory_space<vmem>>, %arg15: memref<8x128xf32, #tpu.memory_space<vmem>>) attributes {dimension_semantics = [#tpu.dimension_semantics<parallel>, #tpu.dimension_semantics<arbitrary>], iteration_bounds = array<i64: 2, 1>, scalar_prefetch = 0 : i64, scratch_operands = 1 : i64, tpu.core_type = #tpu.core_type<tc>, window_params = [{transform_indices = @transform_0, window_bounds = array<i64: 8, 128>}, {pipeline_mode = #tpu.pipeline_mode<synchronous>, transform_indices = @transform_1, window_bounds = array<i64: 128, 128>}, {pipeline_mode = #tpu.pipeline_mode<synchronous>, transform_indices = @transform_2, window_bounds = array<i64: 1, 128>}, {pipeline_mode = #tpu.pipeline_mode<synchronous>, transform_indices = @transform_3, window_bounds = array<i64: 128, 128>}, {pipeline_mode = #tpu.pipeline_mode<synchronous>, transform_indices = @transform_4, window_bounds = array<i64: 1, 128>}, {pipeline_mode = #tpu.pipeline_mode<synchronous>, transform_indices = @transform_5, window_bounds = array<i64: 128, 128>}, {pipeline_mode = #tpu.pipeline_mode<synchronous>, transform_indices = @transform_6, window_bounds = array<i64: 1, 128>}, {pipeline_mode = #tpu.pipeline_mode<synchronous>, transform_indices = @transform_7, window_bounds = array<i64: 128, 128>}, {pipeline_mode = #tpu.pipeline_mode<synchronous>, transform_indices = @transform_8, window_bounds = array<i64: 1, 128>}, {pipeline_mode = #tpu.pipeline_mode<synchronous>, transform_indices = @transform_9, window_bounds = array<i64: 1, 128>}, {transform_indices = @transform_10, window_bounds = array<i64: 1, 1>}, {transform_indices = @transform_11, window_bounds = array<i64: 8, 1>}, {transform_indices = @transform_12, window_bounds = array<i64: 8, 128>}]} {
    %c0_i32 = arith.constant 0 : i32
    %0 = arith.cmpi eq, %arg1, %c0_i32 : i32
    %1 = arith.extui %0 : i1 to i32
    %c0_i32_0 = arith.constant 0 : i32
    %2 = arith.cmpi ne, %1, %c0_i32_0 : i32
    scf.if %2 {
      %cst_10 = arith.constant 0.000000e+00 : f32
      %12 = vector.broadcast %cst_10 : f32 to vector<8x128xf32>
      %c0_11 = arith.constant 0 : index
      %c0_12 = arith.constant 0 : index
      %13 = vector.load %arg15[%c0_11, %c0_12] : memref<8x128xf32, #tpu.memory_space<vmem>>, vector<8x128xf32>
      tpu.vector_store %arg15[%c0_11, %c0_12], %12 {strides = array<i32>} : memref<8x128xf32, #tpu.memory_space<vmem>>, vector<8x128xf32>,
    } else {
    }
    %c0 = arith.constant 0 : index
    %c0_1 = arith.constant 0 : index
    %3 = vector.load %arg15[%c0, %c0_1] : memref<8x128xf32, #tpu.memory_space<vmem>>, vector<8x128xf32>
    %c0_2 = arith.constant 0 : index
    %c0_3 = arith.constant 0 : index
    %4 = vector.load %arg2[%c0_2, %c0_3] : memref<8x128xf32, #tpu.memory_space<vmem>>, vector<8x128xf32>
    %c0_4 = arith.constant 0 : index
    %c0_5 = arith.constant 0 : index
    %5 = vector.load %arg3[%c0_4, %c0_5] : memref<128x128xf32, #tpu.memory_space<vmem>>, vector<128x128xf32>
    %cst = arith.constant dense<0.000000e+00> : vector<8x128xf32>
    %6 = tpu.matmul %4, %5, %cst {dimension_numbers = #tpu.dot_dimension_numbers<[1], [0], [0], [1], [0, 0, 1, 1], [], []>} : vector<8x128xf32>, vector<128x128xf32>, vector<8x128xf32> -> vector<8x128xf32>
    %7 = arith.addf %3, %6 : vector<8x128xf32>
    %c0_6 = arith.constant 0 : index
    %c0_7 = arith.constant 0 : index
    %8 = vector.load %arg15[%c0_6, %c0_7] : memref<8x128xf32, #tpu.memory_space<vmem>>, vector<8x128xf32>
    tpu.vector_store %arg15[%c0_6, %c0_7], %7 {strides = array<i32>} : memref<8x128xf32, #tpu.memory_space<vmem>>, vector<8x128xf32>,
    %c0_i32_8 = arith.constant 0 : i32
    %9 = arith.cmpi eq, %arg1, %c0_i32_8 : i32
    %10 = arith.extui %9 : i1 to i32
    %c0_i32_9 = arith.constant 0 : i32
    %11 = arith.cmpi ne, %10, %c0_i32_9 : i32
    scf.if %11 {
      %c0_10 = arith.constant 0 : index
      %c0_11 = arith.constant 0 : index
      %12 = vector.load %arg15[%c0_10, %c0_11] : memref<8x128xf32, #tpu.memory_space<vmem>>, vector<8x128xf32>
      %c0_12 = arith.constant 0 : index
      %c0_13 = arith.constant 0 : index
      %13 = vector.load %arg4[%c0_12, %c0_13] : memref<1x128xf32, #tpu.memory_space<vmem>>, vector<1x128xf32>
      %14 = vector.broadcast %13 : vector<1x128xf32> to vector<8x128xf32>
      %15 = arith.addf %12, %14 : vector<8x128xf32>
      %cst_14 = arith.constant 0.000000e+00 : f32
      %16 = vector.broadcast %cst_14 : f32 to vector<8x128xf32>
      %17 = arith.maximumf %15, %16 : vector<8x128xf32>
      %c0_15 = arith.constant 0 : index
      %c0_16 = arith.constant 0 : index
      %18 = vector.load %arg5[%c0_15, %c0_16] : memref<128x128xf32, #tpu.memory_space<vmem>>, vector<128x128xf32>
      %cst_17 = arith.constant dense<0.000000e+00> : vector<8x128xf32>
      %19 = tpu.matmul %17, %18, %cst_17 {dimension_numbers = #tpu.dot_dimension_numbers<[1], [0], [0], [1], [0, 0, 1, 1], [], []>} : vector<8x128xf32>, vector<128x128xf32>, vector<8x128xf32> -> vector<8x128xf32>
      %c0_18 = arith.constant 0 : index
      %c0_19 = arith.constant 0 : index
      %20 = vector.load %arg6[%c0_18, %c0_19] : memref<1x128xf32, #tpu.memory_space<vmem>>, vector<1x128xf32>
      %21 = vector.broadcast %20 : vector<1x128xf32> to vector<8x128xf32>
      %22 = arith.addf %19, %21 : vector<8x128xf32>
      %cst_20 = arith.constant 0.000000e+00 : f32
      %23 = vector.broadcast %cst_20 : f32 to vector<8x128xf32>
      %24 = arith.maximumf %22, %23 : vector<8x128xf32>
      %c0_21 = arith.constant 0 : index
      %c0_22 = arith.constant 0 : index
      %25 = vector.load %arg7[%c0_21, %c0_22] : memref<128x128xf32, #tpu.memory_space<vmem>>, vector<128x128xf32>
      %cst_23 = arith.constant dense<0.000000e+00> : vector<8x128xf32>
      %26 = tpu.matmul %24, %25, %cst_23 {dimension_numbers = #tpu.dot_dimension_numbers<[1], [0], [0], [1], [0, 0, 1, 1], [], []>} : vector<8x128xf32>, vector<128x128xf32>, vector<8x128xf32> -> vector<8x128xf32>
      %c0_24 = arith.constant 0 : index
      %c0_25 = arith.constant 0 : index
      %27 = vector.load %arg8[%c0_24, %c0_25] : memref<1x128xf32, #tpu.memory_space<vmem>>, vector<1x128xf32>
      %28 = vector.broadcast %27 : vector<1x128xf32> to vector<8x128xf32>
      %29 = arith.addf %26, %28 : vector<8x128xf32>
      %cst_26 = arith.constant 0.000000e+00 : f32
      %30 = vector.broadcast %cst_26 : f32 to vector<8x128xf32>
      %31 = arith.maximumf %29, %30 : vector<8x128xf32>
      %c0_27 = arith.constant 0 : index
      %c0_28 = arith.constant 0 : index
      %32 = vector.load %arg9[%c0_27, %c0_28] : memref<128x128xf32, #tpu.memory_space<vmem>>, vector<128x128xf32>
      %cst_29 = arith.constant dense<0.000000e+00> : vector<8x128xf32>
      %33 = tpu.matmul %31, %32, %cst_29 {dimension_numbers = #tpu.dot_dimension_numbers<[1], [0], [0], [1], [0, 0, 1, 1], [], []>} : vector<8x128xf32>, vector<128x128xf32>, vector<8x128xf32> -> vector<8x128xf32>
      %c0_30 = arith.constant 0 : index
      %c0_31 = arith.constant 0 : index
      %34 = vector.load %arg10[%c0_30, %c0_31] : memref<1x128xf32, #tpu.memory_space<vmem>>, vector<1x128xf32>
      %35 = vector.broadcast %34 : vector<1x128xf32> to vector<8x128xf32>
      %36 = arith.addf %33, %35 : vector<8x128xf32>
      %cst_32 = arith.constant 0.000000e+00 : f32
      %37 = vector.broadcast %cst_32 : f32 to vector<8x128xf32>
      %38 = arith.maximumf %36, %37 : vector<8x128xf32>
      %c0_33 = arith.constant 0 : index
      %c0_34 = arith.constant 0 : index
      %39 = vector.load %arg14[%c0_33, %c0_34] : memref<8x128xf32, #tpu.memory_space<vmem>>, vector<8x128xf32>
      tpu.vector_store %arg14[%c0_33, %c0_34], %38 {strides = array<i32>} : memref<8x128xf32, #tpu.memory_space<vmem>>, vector<8x128xf32>,
      %c0_35 = arith.constant 0 : index
      %c0_36 = arith.constant 0 : index
      %40 = vector.load %arg11[%c0_35, %c0_36] : memref<1x128xf32, #tpu.memory_space<vmem>>, vector<1x128xf32>
      %41 = vector.broadcast %40 : vector<1x128xf32> to vector<8x128xf32>
      %42 = arith.mulf %38, %41 : vector<8x128xf32>
      %cst_37 = arith.constant dense<0.000000e+00> : vector<8xf32>
      %43 = vector.multi_reduction <add>, %42, %cst_37 [1] : vector<8x128xf32> to vector<8xf32>
      %44 = vector.shape_cast %43 : vector<8xf32> to vector<8x1xf32>
      %c0_38 = arith.constant 0 : index
      %c0_39 = arith.constant 0 : index
      %45 = memref.load %arg12[%c0_38, %c0_39] : memref<1x1xf32, #tpu.memory_space<smem>>
      %46 = vector.broadcast %45 : f32 to vector<8x1xf32>
      %47 = arith.addf %44, %46 : vector<8x1xf32>
      %c0_40 = arith.constant 0 : index
      %c0_41 = arith.constant 0 : index
      %48 = vector.load %arg13[%c0_40, %c0_41] : memref<8x1xf32, #tpu.memory_space<vmem>>, vector<8x1xf32>
      tpu.vector_store %arg13[%c0_40, %c0_41], %47 {strides = array<i32>} : memref<8x1xf32, #tpu.memory_space<vmem>>, vector<8x1xf32>,
    } else {
    }
    return
  }
  func.func @transform_0(%arg0: i32, %arg1: i32) -> (i32, i32) {
    %c0_i32 = arith.constant 0 : i32
    return %arg0, %arg1 : i32, i32
  }
  func.func @transform_1(%arg0: i32, %arg1: i32) -> (i32, i32) {
    %c0_i32 = arith.constant 0 : i32
    %c0_i32_0 = arith.constant 0 : i32
    %c0_i32_1 = arith.constant 0 : i32
    return %c0_i32, %c0_i32_0 : i32, i32
  }
  func.func @transform_2(%arg0: i32, %arg1: i32) -> (i32, i32) {
    %c0_i32 = arith.constant 0 : i32
    %c0_i32_0 = arith.constant 0 : i32
    %c0_i32_1 = arith.constant 0 : i32
    return %c0_i32, %c0_i32_0 : i32, i32
  }
  func.func @transform_3(%arg0: i32, %arg1: i32) -> (i32, i32) {
    %c0_i32 = arith.constant 0 : i32
    %c0_i32_0 = arith.constant 0 : i32
    %c0_i32_1 = arith.constant 0 : i32
    return %c0_i32, %c0_i32_0 : i32, i32
  }
  func.func @transform_4(%arg0: i32, %arg1: i32) -> (i32, i32) {
    %c0_i32 = arith.constant 0 : i32
    %c0_i32_0 = arith.constant 0 : i32
    %c0_i32_1 = arith.constant 0 : i32
    return %c0_i32, %c0_i32_0 : i32, i32
  }
  func.func @transform_5(%arg0: i32, %arg1: i32) -> (i32, i32) {
    %c0_i32 = arith.constant 0 : i32
    %c0_i32_0 = arith.constant 0 : i32
    %c0_i32_1 = arith.constant 0 : i32
    return %c0_i32, %c0_i32_0 : i32, i32
  }
  func.func @transform_6(%arg0: i32, %arg1: i32) -> (i32, i32) {
    %c0_i32 = arith.constant 0 : i32
    %c0_i32_0 = arith.constant 0 : i32
    %c0_i32_1 = arith.constant 0 : i32
    return %c0_i32, %c0_i32_0 : i32, i32
  }
  func.func @transform_7(%arg0: i32, %arg1: i32) -> (i32, i32) {
    %c0_i32 = arith.constant 0 : i32
    %c0_i32_0 = arith.constant 0 : i32
    %c0_i32_1 = arith.constant 0 : i32
    return %c0_i32, %c0_i32_0 : i32, i32
  }
  func.func @transform_8(%arg0: i32, %arg1: i32) -> (i32, i32) {
    %c0_i32 = arith.constant 0 : i32
    %c0_i32_0 = arith.constant 0 : i32
    %c0_i32_1 = arith.constant 0 : i32
    return %c0_i32, %c0_i32_0 : i32, i32
  }
  func.func @transform_9(%arg0: i32, %arg1: i32) -> (i32, i32) {
    %c0_i32 = arith.constant 0 : i32
    %c0_i32_0 = arith.constant 0 : i32
    %c0_i32_1 = arith.constant 0 : i32
    return %c0_i32, %c0_i32_0 : i32, i32
  }
  func.func @transform_10(%arg0: i32, %arg1: i32) -> (i32, i32) {
    %c0_i32 = arith.constant 0 : i32
    %c0_i32_0 = arith.constant 0 : i32
    %c0_i32_1 = arith.constant 0 : i32
    return %c0_i32, %c0_i32_0 : i32, i32
  }
  func.func @transform_11(%arg0: i32, %arg1: i32) -> (i32, i32) {
    %c0_i32 = arith.constant 0 : i32
    %c0_i32_0 = arith.constant 0 : i32
    return %arg0, %c0_i32 : i32, i32
  }
  func.func @transform_12(%arg0: i32, %arg1: i32) -> (i32, i32) {
    %c0_i32 = arith.constant 0 : i32
    %c0_i32_0 = arith.constant 0 : i32
    return %arg0, %c0_i32 : i32, i32
  }
}

</mosaic_0001>

<bundles_post_ra>
// kernel: tpu_custom_call.1
= control target key start
LH: loop header
LB: loop body
LE: loop exit
PB: predicated region body
PF: predicated region fallthrough
CT: control target
= control target key end

     0   :  { %s2031_s0 = inlined_call_operand.hbm [shape: f32[16,128], index: 0, kind: input, shape index: {}]   ;;  %s2032_s1 = inlined_call_operand.hbm [shape: f32[128,128], index: 1, kind: input, shape index: {}]   ;;  %s2033_s2 = inlined_call_operand.vmem [shape: f32[1,128], index: 2, kind: input, shape index: {}]   ;;  %s2034_s3 = inlined_call_operand.hbm [shape: f32[128,128], index: 3, kind: input, shape index: {}]   ;;  %s2035_s4 = inlined_call_operand.vmem [shape: f32[1,128], index: 4, kind: input, shape index: {}]   ;;  %s2036_s5 = inlined_call_operand.hbm [shape: f32[128,128], index: 5, kind: input, shape index: {}]   ;;  %s2037_s6 = inlined_call_operand.vmem [shape: f32[1,128], index: 6, kind: input, shape index: {}]   ;;  %s2038_s7 = inlined_call_operand.hbm [shape: f32[128,128], index: 7, kind: input, shape index: {}]   ;;  %s2039_s8 = inlined_call_operand.vmem [shape: f32[1,128], index: 8, kind: input, shape index: {}]   ;;  %s2040_s9 = inlined_call_operand.vmem [shape: f32[1,128], index: 9, kind: input, shape index: {}]   ;;  %s2041_s10 = inlined_call_operand.<no memory space> [shape: f32[1,1], index: 10, kind: input, shape index: {}]   ;;  %s2042_s11 = inlined_call_operand.vmem [shape: f32[16,1], index: 11, kind: output, shape index: {0}]   ;;  %s2043_s12 = inlined_call_operand.hbm [shape: f32[16,128], index: 12, kind: output, shape index: {1}]  }
   0x1   :  { %2048 = sst [smem:[#allocation22_spill]] %s2032_s1 }
   0x2   :  { %2049 = sst [smem:[#allocation23_spill]] %s2034_s3 }
   0x3   :  { %2050 = sst [smem:[#allocation24_spill]] %s2036_s5 }
   0x4   :  { %2051 = sst [smem:[#allocation25_spill]] %s2038_s7 }
   0x5   :  { %18 = sst [smem:[#allocation3]] %s2041_s10 }
   0x6   :  { %19 = vsyncpa [#allocation5], 0 }
   0x7   :  { %21 = vsyncpa [#allocation5 + $0x1], 0 }
   0x8   :  { %22 = vsyncpa [#allocation8], 0 }
   0x9   :  { %23 = vsyncpa [#allocation11], 0 }
   0xa   :  { %24 = vsyncpa [#allocation6], 0 }
   0xb   :  { %26 = vsyncpa [#allocation6 + $0x1], 0  ;;  %s1724_s23 = smov 0   ;;  %s1726_s24 = smov 0  }
   0xc   :  { %s1728_s25 = smov 0   ;;  %s1730_s26 = smov 0  }
   0xd   :  { %s1732_s27 = smov 0   ;;  %s1734_s28 = smov 0  }
   0xe LB: > { %2052 = sst [smem:[#allocation18_spill]] %s1624_s23  ;;  %s2044_s10 = sadd.s32 4294967295, %s1644_s28   ;;  %s1644_s28 = sphi %s1734_s28, %s32_s28   ;;  %s1640_s27 = sphi %s1732_s27, %s2074_s27   ;;  %s1636_s26 = sphi %s1730_s26, %s2078_s26   ;;  %s1632_s25 = sphi %s1728_s25, %s2077_s25   ;;  %s1628_s24 = sphi %s1726_s24, %s2076_s24   ;;  %s1624_s23 = sphi %s1724_s23, %s2075_s23  }
   0xf   : > { %2053 = sst [smem:[#allocation19_spill]] %s1640_s27  ;;  %p1084_p0 = scmp.ge.s32.totalorder %s1644_s28, 1 }
  0x10   : > { %p1758_p1 = scmp.eq.s32.totalorder %s2044_s10, 0  ;;  %p339_p2 = scmp.lt.s32.totalorder %s1644_s28, 3 }
  0x11   : > { %s1646_s13 = smov [#allocation7]   ;;  %s1647_s16 = smov [#allocation10]  }
  0x12   : > { %p1763_p3 = pnand %p1084_p0, %p339_p2  ;;  %s351_s14 = sshll.u32 %s1646_s13, 4  ;;  %s352_s14 = int_to_ptr.vmem [resolvable:$true] %s351_s14 }
  0x13   : > { %s383_s17 = sshll.u32 %s1647_s16, 4  ;;  %s1648_s18 = smov [#allocation9]   ;;  %s384_s17 = int_to_ptr.vmem [resolvable:$true] %s383_s17 }
  0x14   : > { %p1337_p4 = pneg %p1763_p3  ;;  %s367_s19 = sshll.u32 %s1648_s18, 4  ;;  %s368_s19 = int_to_ptr.vmem [resolvable:$true] %s367_s19 }
  0x15   : > { %s1435_s20 = scalar_lea.vmem %s352_s14, 2048  ;;  %p1443_p11 = scmp.lt.s32.totalorder %s352_s14, %s352_s14 }
  0x16   : > { %p1772_p6 = pnand %p1337_p4, %p1758_p1  ;;  %p1436_p8 = scmp.ne.s32.totalorder %s352_s14, %s1435_s20 }
  0x17   : > { %p1444_p12 = scmp.lt.s32.totalorder %s1435_s20, %s1435_s20 }
  0x18   : > { %p1426_p7 = pneg %p1772_p6 }
  0x19   : > { %p1445_p13 = por %p1444_p12, %p1443_p11 }
  0x1a   : > { %p1438_p9 = pnand %p1436_p8, %p1426_p7 }
  0x1c   : > { %p1439_p10 = pneg %p1438_p9 }
  0x1e   : > { %p1446_p0 = pnand %p1445_p13, %p1439_p10 }
  0x20   : > { %1449 = shalt.err (!%p1446_p0)
}
  0x21   : > { %s1649_s21 = smov 128   ;;  %s1650_s22 = smov 8  }
  0x22   : > { %s2057_s1 = sld [smem:[#allocation22_spill]]  ;;  %s1461_s18 = scalar_lea.vmem %s384_s17, 2048 }
  0x23   : > { %p1462_p2 = scmp.ne.s32.totalorder %s384_s17, %s1461_s18  ;;  %p1469_p9 = scmp.lt.s32.totalorder %s384_s17, %s384_s17 }
  0x24   : > { %p1470_p10 = scmp.lt.s32.totalorder %s1461_s18, %s1461_s18 }
  0x25   : > { %p1464_p4 = pnand %p1462_p2, %p1426_p7 }
  0x26   : > { %p1471_p11 = por %p1470_p10, %p1469_p9 }
  0x27   : > { %p1465_p8 = pneg %p1464_p4 }
  0x28   : > { %1340 = dma.hbm_to_vmem [thread:$0]  (!%p1772_p6), %s2057_s1, 2048, %s352_s14, [#allocation8], %s1649_s21, %s1649_s21, %s1650_s22  }
  0x29   : > { %p1472_p12 = pnand %p1471_p11, %p1465_p8 }
  0x2b   : > { %1475 = shalt.err (!%p1472_p12)
}
  0x2c   : > { %s2058_s5 = sld [smem:[#allocation24_spill]]  ;;  %s1487_s14 = scalar_lea.vmem %s368_s19, 2048 }
  0x2d   : > { %p1488_p13 = scmp.ne.s32.totalorder %s368_s19, %s1487_s14  ;;  %p1495_p4 = scmp.lt.s32.totalorder %s368_s19, %s368_s19 }
  0x2e   : > { %p1496_p8 = scmp.lt.s32.totalorder %s1487_s14, %s1487_s14 }
  0x2f   : > { %p1490_p0 = pnand %p1488_p13, %p1426_p7 }
  0x30   : > { %p1497_p9 = por %p1496_p8, %p1495_p4 }
  0x31   : > { %p1491_p2 = pneg %p1490_p0 }
  0x32   : > { %1346 = dma.hbm_to_vmem [thread:$0]  (!%p1772_p6), %s2058_s5, 2048, %s384_s17, [#allocation11], %s1649_s21, %s1649_s21, %s1650_s22  }
  0x33   : > { %p1498_p10 = pnand %p1497_p9, %p1491_p2 }
  0x35   : > { %1501 = shalt.err (!%p1498_p10)
}
  0x36   : > { %s2059_s3 = sld [smem:[#allocation23_spill]]  ;;  %s1651_s17 = smov [#allocation12]  }
  0x37   : > { %s399_s16 = sshll.u32 %s1651_s17, 4  ;;  %s400_s16 = int_to_ptr.vmem [resolvable:$true] %s399_s16 }
  0x38   : > { %s1513_s18 = scalar_lea.vmem %s400_s16, 2048  ;;  %p1521_p0 = scmp.lt.s32.totalorder %s400_s16, %s400_s16 }
  0x39   : > { %p1514_p11 = scmp.ne.s32.totalorder %s400_s16, %s1513_s18  ;;  %p1522_p2 = scmp.lt.s32.totalorder %s1513_s18, %s1513_s18 }
  0x3b   : > { %p1516_p12 = pnand %p1514_p11, %p1426_p7  ;;  %p1523_p4 = por %p1522_p2, %p1521_p0 }
  0x3c   : > { %1343 = dma.hbm_to_vmem [thread:$0]  (!%p1772_p6), %s2059_s3, 2048, %s368_s19, [#allocation8], %s1649_s21, %s1649_s21, %s1650_s22  }
  0x3d   : > { %p1517_p13 = pneg %p1516_p12 }
  0x3f   : > { %p1524_p8 = pnand %p1523_p4, %p1517_p13 }
  0x41   : > { %1527 = shalt.err (!%p1524_p8)
}
  0x42   : > { %s2060_s7 = sld [smem:[#allocation25_spill]]  ;;  %s1083_s15 = sadd.s32 4294967294, %s1644_s28  }
  0x43   : > { %s44_s14 = sadd.s32 1, %s1640_s27  ;;  %s53_s10 = sadd.s32 1, %s1632_s25 }
  0x44   : > { %p46_p7 = scmp.ge.s32.totalorder %s44_s14, 2  ;;  %p60_p9 = scmp.ne.s32.totalorder %s1632_s25, %s1628_s24 }
  0x45   : > { %p61_p10 = scmp.eq.s32.totalorder %s1644_s28, 0  ;;  %p66_p12 = scmp.ne.s32.totalorder %s1628_s24, %s1624_s23 }
  0x46   : > { %s2080_s14 = smov (%p46_p7, %s44_s14), 0  ;;  %p332_p4 = scmp.eq.s32.totalorder %s1083_s15, 1 }
  0x47   : > { %2061 = sst [smem:[#allocation20_spill]] %s2080_s14  ;;  %p1830_p11 = por %p61_p10, %p60_p9 }
  0x48   : > { %1349 = dma.hbm_to_vmem [thread:$0]  (!%p1772_p6), %s2060_s7, 2048, %s400_s16, [#allocation11], %s1649_s21, %s1649_s21, %s1650_s22  }
  0x49   : > { %s48_s21 = ssub.s32 %s1640_s27, %s2080_s14  ;;  %s2063_s22 = sadd.s32 4294967295, %s1644_s28  }
  0x4a   : > { %p326_p6 = scmp.eq.s32.totalorder %s2063_s22, 1  ;;  %p51_p13 = scmp.eq.s32.totalorder %s48_s21, 0 }
  0x4b   : > { %p1842_p0 = por %p1758_p1, %p66_p12  ;;  %p1853_p8 = por %p332_p4, %p66_p12 }
  0x4c   : > { %p1846_p2 = por %p326_p6, %p60_p9  ;;  %p1362_p7 = scmp.lt.s32.totalorder %s1644_s28, 2 }
  0x4d   : > { %s1851_s18 = scalar_select %p51_p13, %s1632_s25, %s53_s10  }
  0x4e   : > { %s2067_s19 = scalar_select %p1853_p8, 1, 0 }
  0x4f   : > { %2066 = sst [smem:[#allocation21_spill]] %s1851_s18  ;;  %s422_s20 = sand.u32 1, %s1632_s25  }
  0x50   : > { %s1091_s22 = sshll.u32 %s1640_s27, 7  ;;  %s1090_s21 = sshll.u32 %s422_s20, 3 }
  0x51   : > { %s432_s5 = scalar_lea.hbm %s2031_s0, %s1091_s22  ;;  %s426_s7 = scalar_lea.vmem [#allocation4], %s1090_s21 }
  0x52   : > { %s434_s14 = sshll.u32 %s426_s7, 4  ;;  %p1865_p9 = pnand %p1362_p7, %p1830_p11  ;;  %s435_s14 = int_to_ptr.vmem [resolvable:$true] %s434_s14 }
  0x53   : > { %s423_s15 = scalar_lea.sflag [#allocation5], %s422_s20  ;;  %s1541_s10 = scalar_lea.vmem %s435_s14, 128 }
  0x54   : > { %p1530_p10 = pneg %p1865_p9  ;;  %p1542_p12 = scmp.ne.s32.totalorder %s435_s14, %s1541_s10 }
  0x55   : > { %s1652_s27 = smov [#allocation4]  }
  0x56   : > { %p1544_p6 = pnand %p1542_p12, %p1530_p10  ;;  %s1546_s18 = sshll.u32 %s1652_s27, 4  ;;  %s1547_s18 = int_to_ptr.vmem [resolvable:$false] %s1546_s18 }
  0x57   : > { %s1548_s1 = scalar_lea.vmem %s1547_s18, 256  ;;  %p1549_p4 = scmp.lt.s32.totalorder %s435_s14, %s1547_s18 }
  0x58   : > { %p1545_p13 = pneg %p1544_p6  ;;  %p1550_p5 = scmp.lt.s32.totalorder %s1548_s1, %s1541_s10 }
  0x5a   : > { %p1551_p8 = por %p1550_p5, %p1549_p4 }
  0x5c   : > { %p1552_p11 = pnand %p1551_p8, %p1545_p13 }
  0x5e   : > { %1555 = shalt.err (!%p1552_p11)
}
  0x5f   : > { %1353 = dma.hbm_to_vmem [thread:$0]  (!%p1865_p9), %s432_s5, 128, %s435_s14, %s423_s15  }
  0x60   : > { %443 = sbr.rel (%p1763_p3) target bundleno = 1071 (0x42f), region = 64  ;;  %s1876_s3 = sand.u32 (!%p1763_p3), 1, %s1628_s24  }
  0x61   : > { %s1093_s7 = sshll.u32 (!%p1763_p3), %s1876_s3, 3  ;;  %s446_s27 = scalar_lea.sflag (!%p1763_p3), [#allocation5], %s1876_s3 }
  0x62   : > { %s1882_s13 = scalar_lea.vmem (!%p1763_p3), [#allocation4], %s1093_s7 }
  0x65   : > { %1607 = dma.done.wait (%p1842_p0), %s446_s27, 128  }
  0x66   : > { %1609 = vsyncadd (%p1842_p0), %s446_s27, 4294967168 }
  0x67   : > { %1611 = dma.done.wait (%p1758_p1), [#allocation8], 4096  }
  0x68   : > { %1613 = vsyncadd (%p1758_p1), [#allocation8], 4294963200 }
  0x69   : > { %1615 = dma.done.wait (%p1758_p1), [#allocation11], 4096  }
  0x6a   : > { %1617 = vsyncadd (%p1758_p1), [#allocation11], 4294963200  ;;  %v1653_v0 = vmov 0.0   ;;  %vm1654_vm0 = vmmov 0   ;;  %v536_v1 = vld [vmem:[#allocation7 + $0x78] sm:$0xff]  ;;  %v535_v2 = vld [vmem:[#allocation7 + $0x70] sm:$0xff] }
  0x6b   : > { %1177 = vmatprep.subr.mxu0 %v1653_v0  ;;  %1209 = vmatprep.mubr.msk.f32.mxu0 %vm1654_vm0, %v1653_v0  ;;  %v534_v3 = vld [vmem:[#allocation7 + $0x68] sm:$0xff]  ;;  %v533_v4 = vld [vmem:[#allocation7 + $0x60] sm:$0xff]  ;;  %v637_v5 = vld [vmem:[#allocation9 + $0x78] sm:$0xff]  ;;  %s509_s15 = scalar_lea.vmem [#allocation13], %s1093_s7  ;;  %s1106_s10 = sshll.u32 %s1636_s26, 7 }
  0x6c   : > { %1212 = vmatprep.subr.mxu1 %v1653_v0  ;;  %1244 = vmatprep.mubr.msk.f32.mxu1 %vm1654_vm0, %v1653_v0  ;;  %v532_v6 = vld [vmem:[#allocation7 + $0x58] sm:$0xff]  ;;  %v636_v7 = vld [vmem:[#allocation9 + $0x70] sm:$0xff]  ;;  %v635_v8 = vld [vmem:[#allocation9 + $0x68] sm:$0xff]  ;;  %s941_s1 = sshll.u32 %s509_s15, 4  ;;  %s939_s5 = scalar_lea.hbm %s2043_s12, %s1106_s10  ;;  %s942_s1 = int_to_ptr.vmem [resolvable:$true] %s941_s1 }
  0x6d   : > { %1178 = vmatpush3.msra.mxu0 %v536_v1  ;;  %1213 = vmatpush3.msra.mxu1 %v637_v5  ;;  %v531_v9 = vld [vmem:[#allocation7 + $0x50] sm:$0xff]  ;;  %v634_v10 = vld [vmem:[#allocation9 + $0x60] sm:$0xff]  ;;  %v530_v11 = vld [vmem:[#allocation7 + $0x48] sm:$0xff]  ;;  %s925_s23 = scalar_lea.sflag [#allocation6], %s1876_s3  ;;  %s1556_s29 = scalar_lea.vmem %s942_s1, 128 }
  0x6e   : > { %1179 = vmatprep.subr.mxu0 %v1653_v0  ;;  %1214 = vmatprep.subr.mxu1 %v1653_v0  ;;  %v633_v12 = vld [vmem:[#allocation9 + $0x58] sm:$0xff]  ;;  %v529_v13 = vld [vmem:[#allocation7 + $0x40] sm:$0xff]  ;;  %v632_v14 = vld [vmem:[#allocation9 + $0x50] sm:$0xff]  ;;  %p1557_p1 = scmp.ne.s32.totalorder %s942_s1, %s1556_s29  ;;  %s1655_s30 = smov [#allocation13]  }
  0x6f   : > { %1180 = vmatpush3.msra.mxu0 %v535_v2  ;;  %1215 = vmatpush3.msra.mxu1 %v636_v7  ;;  %v528_v15 = vld [vmem:[#allocation7 + $0x38] sm:$0xff]  ;;  %v631_v16 = vld [vmem:[#allocation9 + $0x48] sm:$0xff]  ;;  %v527_v17 = vld [vmem:[#allocation7 + $0x30] sm:$0xff]  ;;  %s1560_s14 = sshll.u32 %s1655_s30, 4  ;;  %s1561_s14 = int_to_ptr.vmem [resolvable:$false] %s1560_s14 }
  0x70   : > { %1181 = vmatprep.subr.mxu0 %v1653_v0  ;;  %1216 = vmatprep.subr.mxu1 %v1653_v0  ;;  %v630_v18 = vld [vmem:[#allocation9 + $0x40] sm:$0xff]  ;;  %v526_v19 = vld [vmem:[#allocation7 + $0x28] sm:$0xff]  ;;  %v629_v20 = vld [vmem:[#allocation9 + $0x38] sm:$0xff]  ;;  %p1558_p3 = pnand %p1557_p1, %p1846_p2  ;;  %s1562_s7 = scalar_lea.vmem %s1561_s14, 256 }
  0x71   : > { %1182 = vmatpush3.msra.mxu0 %v534_v3  ;;  %1217 = vmatpush3.msra.mxu1 %v635_v8  ;;  %v525_v21 = vld [vmem:[#allocation7 + $0x20] sm:$0xff]  ;;  %v628_v22 = vld [vmem:[#allocation9 + $0x30] sm:$0xff]  ;;  %v524_v23 = vld [vmem:[#allocation7 + $0x18] sm:$0xff]  ;;  %p1563_p0 = scmp.lt.s32.totalorder %s942_s1, %s1561_s14  ;;  %p1564_p8 = scmp.lt.s32.totalorder %s1562_s7, %s1556_s29 }
  0x72   : > { %1183 = vmatprep.subr.mxu0 %v1653_v0  ;;  %1218 = vmatprep.subr.mxu1 %v1653_v0  ;;  %v627_v24 = vld [vmem:[#allocation9 + $0x28] sm:$0xff]  ;;  %v523_v25 = vld [vmem:[#allocation7 + $0x10] sm:$0xff]  ;;  %v626_v26 = vld [vmem:[#allocation9 + $0x20] sm:$0xff]  ;;  %p1559_p5 = pneg %p1558_p3 }
  0x73   : > { %1184 = vmatpush3.msra.mxu0 %v533_v4  ;;  %1219 = vmatpush3.msra.mxu1 %v634_v10  ;;  %v522_v27 = vld [vmem:[#allocation7 + $0x8] sm:$0xff]  ;;  %v625_v28 = vld [vmem:[#allocation9 + $0x18] sm:$0xff]  ;;  %v521_v29 = vld [vmem:[#allocation7] sm:$0xff]  ;;  %p1565_p7 = por %p1564_p8, %p1563_p0 }
  0x74   : > { %1185 = vmatprep.subr.mxu0 %v1653_v0  ;;  %1220 = vmatprep.subr.mxu1 %v1653_v0  ;;  %v520_v30 = vld [vmem:[%s1882_s13] sm:$0xff]  ;;  %v623_v32 = vld [vmem:[#allocation9 + $0x8] sm:$0xff]  ;;  %v622_v33 = vld [vmem:[#allocation9] sm:$0xff] }
  0x75   : > { %1186 = vmatpush3.msra.mxu0 %v532_v6  ;;  %1221 = vmatpush3.msra.mxu1 %v633_v12  ;;  %v624_v31 = vld [vmem:[#allocation9 + $0x10] sm:$0xff]  ;;  %v731_v34 = vld [vmem:[#allocation10 + $0x78] sm:$0xff]  ;;  %v729_v36 = vld [vmem:[#allocation10 + $0x68] sm:$0xff]  ;;  %p1566_p9 = pnand %p1565_p7, %p1559_p5 }
  0x76   : > { %1187 = vmatprep.subr.mxu0 %v1653_v0  ;;  %1222 = vmatprep.subr.mxu1 %v1653_v0  ;;  %v730_v35 = vld [vmem:[#allocation10 + $0x70] sm:$0xff]  ;;  %v728_v37 = vld [vmem:[#allocation10 + $0x60] sm:$0xff]  ;;  %v727_v38 = vld [vmem:[#allocation10 + $0x58] sm:$0xff] }
  0x77   : > { %1188 = vmatpush3.msra.mxu0 %v531_v9  ;;  %1223 = vmatpush3.msra.mxu1 %v632_v14  ;;  %v726_v39 = vld [vmem:[#allocation10 + $0x50] sm:$0xff]  ;;  %v725_v40 = vld [vmem:[#allocation10 + $0x48] sm:$0xff]  ;;  %v724_v41 = vld [vmem:[#allocation10 + $0x40] sm:$0xff] }
  0x78   : > { %1189 = vmatprep.subr.mxu0 %v1653_v0  ;;  %1224 = vmatprep.subr.mxu1 %v1653_v0  ;;  %v723_v42 = vld [vmem:[#allocation10 + $0x38] sm:$0xff]  ;;  %v722_v43 = vld [vmem:[#allocation10 + $0x30] sm:$0xff]  ;;  %v721_v44 = vld [vmem:[#allocation10 + $0x28] sm:$0xff] }
  0x79   : > { %1190 = vmatpush3.msra.mxu0 %v530_v11  ;;  %1225 = vmatpush3.msra.mxu1 %v631_v16  ;;  %v720_v45 = vld [vmem:[#allocation10 + $0x20] sm:$0xff]  ;;  %v719_v46 = vld [vmem:[#allocation10 + $0x18] sm:$0xff]  ;;  %v1100_v47 = vld [vmem:[%s2033_s2] ss:$0 sm:$0xff] }
  0x7a   : > { %1191 = vmatprep.subr.mxu0 %v1653_v0  ;;  %1226 = vmatprep.subr.mxu1 %v1653_v0  ;;  %v718_v52 = vld [vmem:[#allocation10 + $0x10] sm:$0xff]  ;;  %v717_v53 = vld [vmem:[#allocation10 + $0x8] sm:$0xff]  ;;  %v716_v54 = vld [vmem:[#allocation10] sm:$0xff] }
  0x7b   : > { %1192 = vmatpush3.msra.mxu0 %v529_v13  ;;  %1227 = vmatpush3.msra.mxu1 %v630_v18  ;;  %v825_v55 = vld [vmem:[#allocation12 + $0x78] sm:$0xff]  ;;  %v824_v56 = vld [vmem:[#allocation12 + $0x70] sm:$0xff]  ;;  %v823_v57 = vld [vmem:[#allocation12 + $0x68] sm:$0xff] }
  0x7c   : > { %1193 = vmatprep.subr.mxu0 %v1653_v0  ;;  %1228 = vmatprep.subr.mxu1 %v1653_v0  ;;  %v822_v58 = vld [vmem:[#allocation12 + $0x60] sm:$0xff]  ;;  %v821_v59 = vld [vmem:[#allocation12 + $0x58] sm:$0xff]  ;;  %v820_v60 = vld [vmem:[#allocation12 + $0x50] sm:$0xff] }
  0x7d   : > { %1194 = vmatpush3.msra.mxu0 %v528_v15  ;;  %1229 = vmatpush3.msra.mxu1 %v629_v20  ;;  %v819_v61 = vld [vmem:[#allocation12 + $0x48] sm:$0xff]  ;;  %v818_v62 = vld [vmem:[#allocation12 + $0x40] sm:$0xff]  ;;  %v817_v63 = vld [vmem:[#allocation12 + $0x38] sm:$0xff] }
  0x7e   : > { %1195 = vmatprep.subr.mxu0 %v1653_v0  ;;  %1230 = vmatprep.subr.mxu1 %v1653_v0  ;;  %v816_v1 = vld [vmem:[#allocation12 + $0x30] sm:$0xff]  ;;  %v815_v2 = vld [vmem:[#allocation12 + $0x28] sm:$0xff]  ;;  %v814_v3 = vld [vmem:[#allocation12 + $0x20] sm:$0xff] }
  0x7f   : > { %1196 = vmatpush3.msra.mxu0 %v527_v17  ;;  %1231 = vmatpush3.msra.mxu1 %v628_v22  ;;  %v813_v4 = vld [vmem:[#allocation12 + $0x18] sm:$0xff]  ;;  %v1101_v5 = vld [vmem:[%s2035_s4] ss:$0 sm:$0xff]  ;;  %v811_v11 = vld [vmem:[#allocation12 + $0x8] sm:$0xff] }
  0x80   : > { %1197 = vmatprep.subr.mxu0 %v1653_v0  ;;  %1232 = vmatprep.subr.mxu1 %v1653_v0  ;;  %v812_v10 = vld [vmem:[#allocation12 + $0x10] sm:$0xff]  ;;  %v810_v12 = vld [vmem:[#allocation12] sm:$0xff] }
  0x81   : > { %1198 = vmatpush3.msra.mxu0 %v526_v19  ;;  %1233 = vmatpush3.msra.mxu1 %v627_v24  ;;  %v1102_v13 = vld [vmem:[%s2037_s6] ss:$0 sm:$0xff] }
  0x82   : > { %1199 = vmatprep.subr.mxu0 %v1653_v0  ;;  %1234 = vmatprep.subr.mxu1 %v1653_v0  ;;  %v1103_v18 = vld [vmem:[%s2039_s8] ss:$0 sm:$0xff] }
  0x83   : > { %1200 = vmatpush3.msra.mxu0 %v525_v21  ;;  %1235 = vmatpush3.msra.mxu1 %v626_v26  ;;  %v1104_v21 = vld [vmem:[%s2040_s9] ss:$0 sm:$0xff] }
  0x84   : > { %1201 = vmatprep.subr.mxu0 %v1653_v0  ;;  %1236 = vmatprep.subr.mxu1 %v1653_v0 }
  0x85   : > { %1202 = vmatpush3.msra.mxu0 %v524_v23  ;;  %1237 = vmatpush3.msra.mxu1 %v625_v28 }
  0x86   : > { %1203 = vmatprep.subr.mxu0 %v1653_v0  ;;  %1238 = vmatprep.subr.mxu1 %v1653_v0 }
  0x87   : > { %1204 = vmatpush3.msra.mxu0 %v523_v25  ;;  %1239 = vmatpush3.msra.mxu1 %v624_v31 }
  0x88   : > { %1205 = vmatprep.subr.mxu0 %v1653_v0  ;;  %1240 = vmatprep.subr.mxu1 %v1653_v0 }
  0x89   : > { %1206 = vmatpush3.msra.mxu0 %v522_v27  ;;  %1241 = vmatpush3.msra.mxu1 %v623_v32 }
  0x8a   : > { %1207 = vmatprep.subr.mxu0 %v1653_v0  ;;  %1242 = vmatprep.subr.mxu1 %v1653_v0 }
  0x8b   : > { %1208 = vmatpush3.msra.mxu0 %v521_v29  ;;  %1243 = vmatpush3.msra.mxu1 %v622_v33 }
  0x8c   : > { %1210 = vmatmul.mubr.f32.vlgmr.msra.gmra.mxu0 %v520_v30  ;;  %1247 = vmatprep.subr.mxu0 %v1653_v0 }
  0x8d   : > { %1279 = vmatprep.mubr.msk.f32.mxu0 %vm1654_vm0, %v1653_v0  ;;  %1282 = vmatprep.subr.mxu1 %v1653_v0 }
  0x8e   : > { %1248 = vmatpush3.msra.mxu0 %v731_v34 }
  0x8f   : > { %1249 = vmatprep.subr.mxu0 %v1653_v0 }
  0x90   : > { %1250 = vmatpush3.msra.mxu0 %v730_v35 }
  0x91   : > { %1251 = vmatprep.subr.mxu0 %v1653_v0 }
  0x92   : > { %1252 = vmatpush3.msra.mxu0 %v729_v36 }
  0x93   : > { %1253 = vmatprep.subr.mxu0 %v1653_v0 }
  0x94   : > { %1254 = vmatpush3.msra.mxu0 %v728_v37 }
  0x95   : > { %1255 = vmatprep.subr.mxu0 %v1653_v0 }
  0x96   : > { %1256 = vmatpush3.msra.mxu0 %v727_v38 }
  0x97   : > { %1257 = vmatprep.subr.mxu0 %v1653_v0 }
  0x98   : > { %1258 = vmatpush3.msra.mxu0 %v726_v39 }
  0x99   : > { %1259 = vmatprep.subr.mxu0 %v1653_v0 }
  0x9a   : > { %1260 = vmatpush3.msra.mxu0 %v725_v40 }
  0x9b   : > { %1261 = vmatprep.subr.mxu0 %v1653_v0 }
  0x9c   : > { %1262 = vmatpush3.msra.mxu0 %v724_v41 }
  0x9d   : > { %1263 = vmatprep.subr.mxu0 %v1653_v0 }
  0x9e   : > { %1264 = vmatpush3.msra.mxu0 %v723_v42 }
  0x9f   : > { %1265 = vmatprep.subr.mxu0 %v1653_v0 }
  0xa0   : > { %1266 = vmatpush3.msra.mxu0 %v722_v43 }
  0xa1   : > { %1267 = vmatprep.subr.mxu0 %v1653_v0 }
  0xa2   : > { %1268 = vmatpush3.msra.mxu0 %v721_v44 }
  0xa3   : > { %1269 = vmatprep.subr.mxu0 %v1653_v0 }
  0xa4   : > { %1270 = vmatpush3.msra.mxu0 %v720_v45 }
  0xa5   : > { %1271 = vmatprep.subr.mxu0 %v1653_v0 }
  0xa6   : > { %1272 = vmatpush3.msra.mxu0 %v719_v46 }
  0xa7   : > { %1273 = vmatprep.subr.mxu0 %v1653_v0 }
  0xa8   : > { %1274 = vmatpush3.msra.mxu0 %v718_v52 }
  0xa9   : > { %1275 = vmatprep.subr.mxu0 %v1653_v0 }
  0xaa   : > { %1276 = vmatpush3.msra.mxu0 %v717_v53 }
  0xab   : > { %1277 = vmatprep.subr.mxu0 %v1653_v0 }
  0xac   : > { %1278 = vmatpush3.msra.mxu0 %v716_v54 }
 0x14c   : > { %v603_v48 = vpop.f32.mrf.mxu0 }
 0x14d   : > { %v620_v49 = vadd.f32 %v1100_v47, %v603_v48 }
 0x14e   : > { %v1211_v50 = vpop.f32.mrf.mxu0 }
 0x14f   : > { %v621_v51 = vmax.f32 %v620_v49, 0.0 }
 0x151   : > { %1245 = vmatmul.mubr.f32.vlgmr.msra.gmra.mxu1 %v621_v51 }
 0x152   : > { %1314 = vmatprep.mubr.msk.f32.mxu1 %vm1654_vm0, %v1653_v0  ;;  %1283 = vmatpush3.msra.mxu1 %v825_v55 }
 0x153   : > { %1284 = vmatprep.subr.mxu1 %v1653_v0 }
 0x154   : > { %1285 = vmatpush3.msra.mxu1 %v824_v56 }
 0x155   : > { %1286 = vmatprep.subr.mxu1 %v1653_v0 }
 0x156   : > { %1287 = vmatpush3.msra.mxu1 %v823_v57 }
 0x157   : > { %1288 = vmatprep.subr.mxu1 %v1653_v0 }
 0x158   : > { %1289 = vmatpush3.msra.mxu1 %v822_v58 }
 0x159   : > { %1290 = vmatprep.subr.mxu1 %v1653_v0 }
 0x15a   : > { %1291 = vmatpush3.msra.mxu1 %v821_v59 }
 0x15b   : > { %1292 = vmatprep.subr.mxu1 %v1653_v0 }
 0x15c   : > { %1293 = vmatpush3.msra.mxu1 %v820_v60 }
 0x15d   : > { %1294 = vmatprep.subr.mxu1 %v1653_v0 }
 0x15e   : > { %1295 = vmatpush3.msra.mxu1 %v819_v61 }
 0x15f   : > { %1296 = vmatprep.subr.mxu1 %v1653_v0 }
 0x160   : > { %1297 = vmatpush3.msra.mxu1 %v818_v62 }
 0x161   : > { %1298 = vmatprep.subr.mxu1 %v1653_v0 }
 0x162   : > { %1299 = vmatpush3.msra.mxu1 %v817_v63 }
 0x163   : > { %1300 = vmatprep.subr.mxu1 %v1653_v0 }
 0x164   : > { %1301 = vmatpush3.msra.mxu1 %v816_v1 }
 0x165   : > { %1302 = vmatprep.subr.mxu1 %v1653_v0 }
 0x166   : > { %1303 = vmatpush3.msra.mxu1 %v815_v2 }
 0x167   : > { %1304 = vmatprep.subr.mxu1 %v1653_v0 }
 0x168   : > { %1305 = vmatpush3.msra.mxu1 %v814_v3 }
 0x169   : > { %1306 = vmatprep.subr.mxu1 %v1653_v0 }
 0x16a   : > { %1307 = vmatpush3.msra.mxu1 %v813_v4 }
 0x16b   : > { %1308 = vmatprep.subr.mxu1 %v1653_v0 }
 0x16c   : > { %1309 = vmatpush3.msra.mxu1 %v812_v10 }
 0x16d   : > { %1310 = vmatprep.subr.mxu1 %v1653_v0 }
 0x16e   : > { %1311 = vmatpush3.msra.mxu1 %v811_v11 }
 0x16f   : > { %1312 = vmatprep.subr.mxu1 %v1653_v0 }
 0x170   : > { %1313 = vmatpush3.msra.mxu1 %v810_v12 }
 0x211   : > { %v711_v6 = vpop.f32.mrf.mxu1 }
 0x212   : > { %v712_v7 = vadd.f32 %v1101_v5, %v711_v6 }
 0x213   : > { %v1246_v8 = vpop.f32.mrf.mxu1 }
 0x214   : > { %v715_v9 = vmax.f32 %v712_v7, 0.0 }
 0x216   : > { %1280 = vmatmul.mubr.f32.vlgmr.msra.gmra.mxu0 %v715_v9 }
 0x2d6   : > { %v805_v14 = vpop.f32.mrf.mxu0 }
 0x2d7   : > { %v806_v15 = vadd.f32 %v1102_v13, %v805_v14 }
 0x2d8   : > { %v1281_v16 = vpop.f32.mrf.mxu0 }
 0x2d9   : > { %v809_v17 = vmax.f32 %v806_v15, 0.0 }
 0x2db   : > { %1315 = vmatmul.mubr.f32.vlgmr.msra.gmra.mxu1 %v809_v17 }
 0x39b   : > { %v899_v19 = vpop.f32.mrf.mxu1 }
 0x39c   : > { %v900_v0 = vadd.f32 %v1103_v18, %v899_v19 }
 0x39d   : > { %v1316_v20 = vpop.f32.mrf.mxu1 }
 0x39e   : > { %v903_v22 = vmax.f32 %v900_v0, 0.0 }
 0x3a0   : > { %904 = vst [vmem:[%s509_s15] sm:$0xff] %v903_v22  ;;  %v912_v23 = vmul.f32 %v1104_v21, %v903_v22 }
 0x3a2   : > { %913 = vadd.xlane.f32.xlu0 %v912_v23 }
 0x3a3   : > { %1569 = shalt.err (!%p1566_p9)
}
 0x3a4   : > { %s1570_s17 = scalar_lea.hbm %s939_s5, 128  ;;  %s1574_s20 = scalar_lea.hbm %s2043_s12, 256 }
 0x3a5   : > { %p1571_p10 = scmp.ne.s32.totalorder %s939_s5, %s1570_s17  ;;  %p1575_p13 = scmp.lt.s32.totalorder %s939_s5, %s2043_s12 }
 0x3a6   : > { %p1576_p4 = scmp.lt.s32.totalorder %s1574_s20, %s1570_s17 }
 0x3a7   : > { %p1572_p12 = pnand %p1571_p10, %p1846_p2 }
 0x3a8   : > { %p1577_p11 = por %p1576_p4, %p1575_p13 }
 0x3a9   : > { %p1573_p6 = pneg %p1572_p12 }
 0x3ab   : > { %p1578_p1 = pnand %p1577_p11, %p1573_p6 }
 0x3ad   : > { %1581 = shalt.err (!%p1578_p1)
}
 0x3ae   : > { %1335 = dma.vmem_to_hbm [thread:$0]  (%p1846_p2), %s942_s1, 128, %s939_s5, %s925_s23   ;;  %vm918_vm1 = vcmask 7168  }
 0x3af   : > { %p510_p3 = scmp.lt.s32.totalorder %s1636_s26, 1  ;;  %s915_s15 = sld [smem:[#allocation3]] }
 0x3b1   : > { %s2082_s26 = smov (!%p510_p3, %s1636_s26), 1 }
 0x3b2   : > { %s1099_s10 = sshll.u32 %s2082_s26, 3 }
 0x3b3   : > { %s513_s29 = scalar_lea.vmem %s2042_s11, %s1099_s10 }
 0x3b5   : > { %v916_v24 = vstv %s915_s15 }
 0x42b   : > { %v914_v25 = vpop.xlane.xlu0 %913 }
 0x42c   : > { %v917_v26 = vadd.f32 %v916_v24, %v914_v25 }
 0x42e   : > { %919 = vst.msk [vmem:[%s513_s29] sm:$0xff] %vm918_vm1, %v917_v26 }
 0x42f PF: > { %s2069_s30 = sld [smem:[#allocation18_spill]]  ;;  %p2070_p5 = scmp.ne.s32.totalorder %s2067_s19, 0 }
 0x430   : > { %p2071_p2 = scmp.ge.s32.totalorder %s1644_s28, 2 }
 0x432   : > { %p1355_p0 = pnand %p2071_p2, %p2070_p5 }
 0x434   : > { %p1356_p8 = pneg %p1355_p0 }
 0x435   : > { %s960_s16 = sand.u32 1, %s2069_s30  }
 0x436   : > { %s961_s1 = scalar_lea.sflag [#allocation6], %s960_s16 }
 0x437   : > { %1619 = dma.done.wait (%p1356_p8), %s961_s1, 128  }
 0x438   : > { %1621 = vsyncadd (%p1356_p8), %s961_s1, 4294967168  ;;  %s32_s28 = sadd.s32 1, %s1644_s28   ;;  %s2072_s26 = sld [smem:[#allocation21_spill]] }
 0x439   : > { %p29_p7 = scmp.ge.s32.totalorder %s32_s28, 4   ;;  %s2073_s5 = sld [smem:[#allocation19_spill]] }
 0x43a   : > { %s2074_s27 = sld [smem:[#allocation20_spill]]  ;;  %s2075_s23 = smov %s1628_s24 }
 0x43b   : > { %s2076_s24 = smov %s1632_s25  ;;  %31 = sbr.rel (!%p29_p7) target bundleno = 14 (0xe), region = 145 }
 0x43e   : > { %s2077_s25 = smov %s2072_s26 }
 0x43f   : > { %s2078_s26 = smov %s2073_s5 }
 0x440   :  { %966 = vsyncpa [#allocation5], 1 }
 0x441   :  { %968 = vsyncpa [#allocation5 + $0x1], 1 }
 0x442   :  { %969 = vsyncpa [#allocation8], 1 }
 0x443   :  { %970 = vsyncpa [#allocation11], 1 }
 0x444   :  { %971 = vsyncpa [#allocation6], 1 }
 0x445   :  { %973 = vsyncpa [#allocation6 + $0x1], 1 }

</bundles_post_ra>
